<compile_context>
chip_gen: v7x
topology: tpu7x:2x2x1
jax: 0.10.0
libtpu: 0.0.40
codegen_flags: <defaults>
</compile_context>

<pallas_src>
import functools

import jax
import jax.numpy as jnp
from jax.experimental import pallas as pl
from jax.experimental.pallas import tpu as pltpu


# ----------------------------------------------------------------------------
# Kernel: tiled  out = act(x @ w.T + b)
# ----------------------------------------------------------------------------
def _linear_kernel(x_ref, w_ref, b_ref, o_ref, acc_ref, *, activation):
    k = pl.program_id(2)

    @pl.when(k == 0)
    def _():
        acc_ref[...] = jnp.zeros_like(acc_ref)

    # x tile: (tm, tk), w tile: (tn, tk) (PyTorch nn.Linear layout).
    # Contract dim 1 of x with dim 1 of w -> (tm, tn); no XLU transpose.
    acc_ref[...] += jax.lax.dot_general(
        x_ref[...],
        w_ref[...],
        dimension_numbers=(((1,), (1,)), ((), ())),
        preferred_element_type=jnp.float32,
    )

    @pl.when(k == pl.num_programs(2) - 1)
    def _():
        acc = acc_ref[...] + b_ref[...].astype(jnp.float32)
        if activation == "silu":
            acc = acc * jax.nn.sigmoid(acc)  # SiLU fused in the epilogue (f32)
        o_ref[...] = acc.astype(o_ref.dtype)


# ----------------------------------------------------------------------------
# Wrapper
# ----------------------------------------------------------------------------
def _pick_tile(dim, target, align):
    """Largest legal tile <= target: a multiple of `align` dividing `dim`,
    or the full dim when dim is small / has no aligned divisor."""
    if dim <= target:
        return dim
    t = (target // align) * align
    while t >= align:
        if dim % t == 0:
            return t
        t -= align
    return dim


def pallas_linear(x, w, b, *, activation=None, tm=256, tn=256, tk=512):
    """x: (M, K), w: (N, K) (PyTorch layout), b: (N,) -> (M, N)."""
    M, K = x.shape
    N, K2 = w.shape
    assert K == K2 and b.shape == (N,)

    tm = _pick_tile(M, tm, 8)
    tn = _pick_tile(N, tn, 128)
    tk = _pick_tile(K, tk, 128)
    grid = (M // tm, N // tn, K // tk)

    b2 = b.reshape(1, N)
    kernel = functools.partial(_linear_kernel, activation=activation)

    return pl.pallas_call(
        kernel,
        out_shape=jax.ShapeDtypeStruct((M, N), x.dtype),
        grid=grid,
        in_specs=[
            pl.BlockSpec((tm, tk), lambda i, j, k: (i, k)),   # x
            pl.BlockSpec((tn, tk), lambda i, j, k: (j, k)),   # w (out, in)
            pl.BlockSpec((1, tn), lambda i, j, k: (0, j)),    # bias
        ],
        out_specs=pl.BlockSpec((tm, tn), lambda i, j, k: (i, j)),
        scratch_shapes=[pltpu.VMEM((tm, tn), jnp.float32)],
        compiler_params=pltpu.CompilerParams(
            dimension_semantics=("parallel", "parallel", "arbitrary"),
        ),
    )(x, w, b2)


# ----------------------------------------------------------------------------
# Full forward pass (matches torch MLP.forward)
# ----------------------------------------------------------------------------
def mlp_forward(hidden_states, params):
    orig_shape = hidden_states.shape
    hidden_size = orig_shape[-1]
    x2 = hidden_states.reshape(-1, hidden_size)

    h = pallas_linear(x2, params["fc1_w"], params["fc1_b"], activation="silu")
    out = pallas_linear(h, params["fc2_w"], params["fc2_b"], activation=None)
    return out.reshape(orig_shape)


# ----------------------------------------------------------------------------
# Pure-JAX reference (mirrors the PyTorch code path) for a correctness check.
# ----------------------------------------------------------------------------
def mlp_ref(hidden_states, params):
    h = hidden_states @ params["fc1_w"].T + params["fc1_b"]
    h = h * jax.nn.sigmoid(h)  # SiLU
    return h @ params["fc2_w"].T + params["fc2_b"]


# ----------------------------------------------------------------------------
# Main
# ----------------------------------------------------------------------------
if __name__ == "__main__":
    # module config: MLP(hidden_size, intermediate_size, mult=4)
    hidden_size = 32
    intermediate_size = 32
    mult = 4
    inner_dim = intermediate_size * mult  # 128

    # example input shape: Batch x Time x Channel
    batch, seq_len = 2, 8

    key = jax.random.PRNGKey(0)
    keys = jax.random.split(key, 5)

    def init_linear(kw, kb, out_dim, in_dim):
        w = jax.random.normal(kw, (out_dim, in_dim), jnp.float32) * 0.02
        b = jax.random.normal(kb, (out_dim,), jnp.float32) * 0.02
        return w, b

    fc1_w, fc1_b = init_linear(keys[0], keys[1], inner_dim, hidden_size)
    fc2_w, fc2_b = init_linear(keys[2], keys[3], hidden_size, inner_dim)
    params = dict(fc1_w=fc1_w, fc1_b=fc1_b, fc2_w=fc2_w, fc2_b=fc2_b)

    hidden_states = jax.random.normal(
        keys[4], (batch, seq_len, hidden_size), jnp.float32
    )

    out = mlp_forward(hidden_states, params)
    out = jax.block_until_ready(out)

    ref = mlp_ref(hidden_states, params)
    assert out.shape == (batch, seq_len, hidden_size)
    assert jnp.allclose(out, ref, atol=1e-4, rtol=1e-4), "mismatch vs reference"

    print("KERNEL_OK")
</pallas_src>

<mosaic_0001>
module attributes {stable_mosaic.version = 11 : i64} {
  func.func @_linear_kernel(%arg0: i32, %arg1: i32, %arg2: i32, %arg3: memref<16x32xf32, #tpu.memory_space<vmem>>, %arg4: memref<128x32xf32, #tpu.memory_space<vmem>>, %arg5: memref<1x128xf32, #tpu.memory_space<vmem>>, %arg6: memref<16x128xf32, #tpu.memory_space<vmem>>, %arg7: memref<16x128xf32, #tpu.memory_space<vmem>>) attributes {dimension_semantics = [#tpu.dimension_semantics<parallel>, #tpu.dimension_semantics<parallel>, #tpu.dimension_semantics<arbitrary>], iteration_bounds = array<i64: 1, 1, 1>, scalar_prefetch = 0 : i64, scratch_operands = 1 : i64, tpu.core_type = #tpu.core_type<tc>, window_params = [{transform_indices = @transform_0, window_bounds = array<i64: 16, 32>}, {transform_indices = @transform_1, window_bounds = array<i64: 128, 32>}, {transform_indices = @transform_2, window_bounds = array<i64: 1, 128>}, {transform_indices = @transform_3, window_bounds = array<i64: 16, 128>}]} {
    %c0_i32 = arith.constant 0 : i32
    %0 = arith.cmpi eq, %arg2, %c0_i32 : i32
    %1 = arith.extui %0 : i1 to i32
    %c0_i32_0 = arith.constant 0 : i32
    %2 = arith.cmpi ne, %1, %c0_i32_0 : i32
    scf.if %2 {
      %cst_10 = arith.constant 0.000000e+00 : f32
      %12 = vector.broadcast %cst_10 : f32 to vector<16x128xf32>
      %c0_11 = arith.constant 0 : index
      %c0_12 = arith.constant 0 : index
      %13 = vector.load %arg7[%c0_11, %c0_12] : memref<16x128xf32, #tpu.memory_space<vmem>>, vector<16x128xf32>
      tpu.vector_store %arg7[%c0_11, %c0_12], %12 {strides = array<i32>} : memref<16x128xf32, #tpu.memory_space<vmem>>, vector<16x128xf32>,
    } else {
    }
    %c0 = arith.constant 0 : index
    %c0_1 = arith.constant 0 : index
    %3 = vector.load %arg7[%c0, %c0_1] : memref<16x128xf32, #tpu.memory_space<vmem>>, vector<16x128xf32>
    %c0_2 = arith.constant 0 : index
    %c0_3 = arith.constant 0 : index
    %4 = vector.load %arg3[%c0_2, %c0_3] : memref<16x32xf32, #tpu.memory_space<vmem>>, vector<16x32xf32>
    %c0_4 = arith.constant 0 : index
    %c0_5 = arith.constant 0 : index
    %5 = vector.load %arg4[%c0_4, %c0_5] : memref<128x32xf32, #tpu.memory_space<vmem>>, vector<128x32xf32>
    %cst = arith.constant dense<0.000000e+00> : vector<16x128xf32>
    %6 = tpu.matmul %4, %5, %cst {dimension_numbers = #tpu.dot_dimension_numbers<[1], [1], [0], [0], [0, 0, 1, 0], [], []>} : vector<16x32xf32>, vector<128x32xf32>, vector<16x128xf32> -> vector<16x128xf32>
    %7 = arith.addf %3, %6 : vector<16x128xf32>
    %c0_6 = arith.constant 0 : index
    %c0_7 = arith.constant 0 : index
    %8 = vector.load %arg7[%c0_6, %c0_7] : memref<16x128xf32, #tpu.memory_space<vmem>>, vector<16x128xf32>
    tpu.vector_store %arg7[%c0_6, %c0_7], %7 {strides = array<i32>} : memref<16x128xf32, #tpu.memory_space<vmem>>, vector<16x128xf32>,
    %c0_i32_8 = arith.constant 0 : i32
    %9 = arith.cmpi eq, %arg2, %c0_i32_8 : i32
    %10 = arith.extui %9 : i1 to i32
    %c0_i32_9 = arith.constant 0 : i32
    %11 = arith.cmpi ne, %10, %c0_i32_9 : i32
    scf.if %11 {
      %c0_10 = arith.constant 0 : index
      %c0_11 = arith.constant 0 : index
      %12 = vector.load %arg7[%c0_10, %c0_11] : memref<16x128xf32, #tpu.memory_space<vmem>>, vector<16x128xf32>
      %c0_12 = arith.constant 0 : index
      %c0_13 = arith.constant 0 : index
      %13 = vector.load %arg5[%c0_12, %c0_13] : memref<1x128xf32, #tpu.memory_space<vmem>>, vector<1x128xf32>
      %14 = vector.broadcast %13 : vector<1x128xf32> to vector<16x128xf32>
      %15 = arith.addf %12, %14 : vector<16x128xf32>
      %16 = arith.negf %15 : vector<16x128xf32>
      %17 = math.exp %16 : vector<16x128xf32>
      %cst_14 = arith.constant 1.000000e+00 : f32
      %18 = vector.broadcast %cst_14 : f32 to vector<16x128xf32>
      %19 = arith.addf %18, %17 : vector<16x128xf32>
      %20 = arith.divf %18, %19 : vector<16x128xf32>
      %21 = arith.mulf %15, %20 : vector<16x128xf32>
      %c0_15 = arith.constant 0 : index
      %c0_16 = arith.constant 0 : index
      %22 = vector.load %arg6[%c0_15, %c0_16] : memref<16x128xf32, #tpu.memory_space<vmem>>, vector<16x128xf32>
      tpu.vector_store %arg6[%c0_15, %c0_16], %21 {strides = array<i32>} : memref<16x128xf32, #tpu.memory_space<vmem>>, vector<16x128xf32>,
    } else {
    }
    return
  }
  func.func @transform_0(%arg0: i32, %arg1: i32, %arg2: i32) -> (i32, i32) {
    %c0_i32 = arith.constant 0 : i32
    return %arg0, %arg2 : i32, i32
  }
  func.func @transform_1(%arg0: i32, %arg1: i32, %arg2: i32) -> (i32, i32) {
    %c0_i32 = arith.constant 0 : i32
    return %arg1, %arg2 : i32, i32
  }
  func.func @transform_2(%arg0: i32, %arg1: i32, %arg2: i32) -> (i32, i32) {
    %c0_i32 = arith.constant 0 : i32
    %c0_i32_0 = arith.constant 0 : i32
    return %c0_i32, %arg1 : i32, i32
  }
  func.func @transform_3(%arg0: i32, %arg1: i32, %arg2: i32) -> (i32, i32) {
    %c0_i32 = arith.constant 0 : i32
    return %arg0, %arg1 : i32, i32
  }
}

</mosaic_0001>

<bundles_post_ra>
// kernel: tpu_custom_call.1
= control target key start
LH: loop header
LB: loop body
LE: loop exit
PB: predicated region body
PF: predicated region fallthrough
CT: control target
= control target key end

     0   :  { %vm41_vm0 = vcmask 261120   ;;  %s510_s0 = inlined_call_operand.vmem [shape: f32[16,32], index: 0, kind: input, shape index: {}]   ;;  %s511_s1 = inlined_call_operand.vmem [shape: f32[128,32], index: 1, kind: input, shape index: {}]   ;;  %s512_s2 = inlined_call_operand.vmem [shape: f32[1,128], index: 2, kind: input, shape index: {}]   ;;  %s513_s3 = inlined_call_operand.hbm [shape: f32[16,128], index: 3, kind: output, shape index: {}]  }
   0x1   :  { %v25_v0 = vld [vmem:[%s511_s1] sm:$0xff]  ;;  %v26_v1 = vld [vmem:[%s511_s1 + $0x8] sm:$0xff]  ;;  %v27_v2 = vld [vmem:[%s511_s1 + $0x10] sm:$0xff] }
   0x2   :  { %v295_v3 = vpack.c.bf16 %v26_v1, %v25_v0  ;;  %vm412_vm1 = vmpackc.low %vm41_vm0, %vm41_vm0  ;;  %v28_v5 = vld [vmem:[%s511_s1 + $0x18] sm:$0xff]  ;;  %v23_v7 = vld [vmem:[%s510_s0] sm:$0xff] }
   0x3   :  { %v301_v6 = vpack.c.bf16 %v28_v5, %v27_v2  ;;  %v29_v8 = vld [vmem:[%s511_s1 + $0x20] sm:$0xff]  ;;  %v30_v9 = vld [vmem:[%s511_s1 + $0x28] sm:$0xff]  ;;  %292 = vmatprep.mubr.msk.f32.mxu0 %vm41_vm0, %v23_v7 }
   0x4   :  { %297 = vmatprep.subr.msk.bf16.mxu0 %vm412_vm1, %v295_v3 }
   0x5   :  { %300 = vmatpush3.bf16.xpose.msk.msra.mxu0 %vm412_vm1, %v295_v3 }
   0x6   :  { %303 = vmatprep.subr.msk.bf16.mxu0 %vm412_vm1, %v301_v6 }
   0x7   :  { %8 = vsyncpa [#allocation4], 0  ;;  %v307_v10 = vpack.c.bf16 %v30_v9, %v29_v8  ;;  %v31_v11 = vld [vmem:[%s511_s1 + $0x30] sm:$0xff]  ;;  %v32_v12 = vld [vmem:[%s511_s1 + $0x38] sm:$0xff] }
   0x8   :  { %v313_v13 = vpack.c.bf16 %v32_v12, %v31_v11  ;;  %v33_v14 = vld [vmem:[%s511_s1 + $0x40] sm:$0xff]  ;;  %v34_v15 = vld [vmem:[%s511_s1 + $0x48] sm:$0xff]  ;;  %v35_v17 = vld [vmem:[%s511_s1 + $0x50] sm:$0xff] }
   0x9   :  { %v319_v16 = vpack.c.bf16 %v34_v15, %v33_v14  ;;  %v36_v18 = vld [vmem:[%s511_s1 + $0x58] sm:$0xff]  ;;  %v37_v20 = vld [vmem:[%s511_s1 + $0x60] sm:$0xff]  ;;  %v38_v21 = vld [vmem:[%s511_s1 + $0x68] sm:$0xff] }
   0xa   :  { %v325_v19 = vpack.c.bf16 %v36_v18, %v35_v17  ;;  %v331_v22 = vpack.c.bf16 %v38_v21, %v37_v20  ;;  %v39_v23 = vld [vmem:[%s511_s1 + $0x70] sm:$0xff]  ;;  %v40_v24 = vld [vmem:[%s511_s1 + $0x78] sm:$0xff]  ;;  %v24_v26 = vld [vmem:[%s510_s0 + $0x8] sm:$0xff]  ;;  %s378_s0 = smov [#allocation3]  }
   0xb   :  { %v337_v25 = vpack.c.bf16 %v40_v24, %v39_v23  ;;  %v239_v27 = vld [vmem:[%s512_s2] ss:$0 sm:$0xff]  ;;  %s210_s1 = sshll.u32 %s378_s0, 4  ;;  %s211_s1 = int_to_ptr.vmem [resolvable:$true] %s210_s1 }
   0xc   :  { %s354_s2 = scalar_lea.vmem %s211_s1, 256  ;;  %p359_p1 = scmp.lt.s32.totalorder %s211_s1, %s211_s1 }
   0xd   :  { %306 = vmatpush3.bf16.xpose.msk.msra.mxu0 %vm412_vm1, %v301_v6  ;;  %p355_p0 = scmp.ne.s32.totalorder %s211_s1, %s354_s2  ;;  %p360_p2 = scmp.lt.s32.totalorder %s354_s2, %s354_s2 }
   0xe   :  { %309 = vmatprep.subr.msk.bf16.mxu0 %vm412_vm1, %v307_v10 }
   0xf   :  { %p361_p3 = por %p360_p2, %p359_p1 }
  0x11   :  { %p362_p4 = pnand %p361_p3, %p355_p0 }
  0x15   :  { %312 = vmatpush3.bf16.xpose.msk.msra.mxu0 %vm412_vm1, %v307_v10 }
  0x16   :  { %315 = vmatprep.subr.msk.bf16.mxu0 %vm412_vm1, %v313_v13 }
  0x1d   :  { %318 = vmatpush3.bf16.xpose.msk.msra.mxu0 %vm412_vm1, %v313_v13 }
  0x1e   :  { %321 = vmatprep.subr.msk.bf16.mxu0 %vm412_vm1, %v319_v16 }
  0x25   :  { %324 = vmatpush3.bf16.xpose.msk.msra.mxu0 %vm412_vm1, %v319_v16 }
  0x26   :  { %327 = vmatprep.subr.msk.bf16.mxu0 %vm412_vm1, %v325_v19 }
  0x2d   :  { %330 = vmatpush3.bf16.xpose.msk.msra.mxu0 %vm412_vm1, %v325_v19 }
  0x2e   :  { %333 = vmatprep.subr.msk.bf16.mxu0 %vm412_vm1, %v331_v22 }
  0x35   :  { %336 = vmatpush3.bf16.xpose.msk.msra.mxu0 %vm412_vm1, %v331_v22 }
  0x36   :  { %339 = vmatprep.subr.msk.bf16.mxu0 %vm412_vm1, %v337_v25 }
  0x3d   :  { %342 = vmatpush3.bf16.xpose.msk.msra.mxu0 %vm412_vm1, %v337_v25 }
  0x44   :  { %293 = vmatmul.mubr.msk.f32.vlgmr.msra.gmra.mrb[0].mxu0 %vm41_vm0, %v24_v26 }
 0x117   :  { %v294_v28 = vpop.f32.mrb[0].mxu0 }
 0x118   :  { %v188_v29 = vadd.f32 %v294_v28, %v239_v27  ;;  %v162_v30 = vpop.f32.mrb[1].mxu0 }
 0x119   :  { %v187_v31 = vadd.f32 %v239_v27, %v162_v30 }
 0x11a   :  { %v241_v32 = vmul.f32 -1.442695, %v188_v29 }
 0x11b   :  { %v240_v33 = vmul.f32 -1.442695, %v187_v31 }
 0x11c   :  { %346 = vpow2.f32 %v241_v32 }
 0x11d   :  { %348 = vpow2.f32 %v240_v33 }
 0x126   :  { %v347_v34 = vpop.eup %346 }
 0x127   :  { %v349_v35 = vpop.eup %348  ;;  %v196_v36 = vadd.f32 1.0, %v347_v34 }
 0x128   :  { %v195_v37 = vadd.f32 1.0, %v349_v35 }
 0x129   :  { %350 = vrcp.f32 %v196_v36 }
 0x12a   :  { %352 = vrcp.f32 %v195_v37 }
 0x133   :  { %v351_v38 = vpop.eup %350 }
 0x134   :  { %v353_v39 = vpop.eup %352  ;;  %v202_v40 = vmul.f32 %v351_v38, %v188_v29 }
 0x135   :  { %v201_v41 = vmul.f32 %v353_v39, %v187_v31 }
 0x136   :  { %204 = vst [vmem:[#allocation3 + $0x8] sm:$0xff] %v202_v40 }
 0x137   :  { %203 = vst [vmem:[#allocation3] sm:$0xff] %v201_v41 }
 0x138   :  { %365 = shalt.err (!%p362_p4)
}
 0x139   :  { %s366_s25 = scalar_lea.hbm %s513_s3, 256 }
 0x13a   :  { %p367_p5 = scmp.ne.s32.totalorder %s513_s3, %s366_s25  ;;  %p370_p6 = scmp.lt.u32.totalorder %s366_s25, %s513_s3 }
 0x13c   :  { %p372_p7 = pnand %p370_p6, %p367_p5 }
 0x13e   :  { %375 = shalt.err (!%p372_p7)
}
 0x13f   :  { %s379_s30 = smov 128   ;;  %s380_s4 = smov 8  }
 0x140   :  { %216 = dma.vmem_to_hbm [thread:$0]  %s211_s1, 256, %s513_s3, [#allocation4], %s379_s30, %s379_s30, %s380_s4  }
 0x141   :  { %376 = dma.done.wait [#allocation4], 256  }
 0x142   :  { %377 = vsyncadd [#allocation4], 4294967040 }
 0x143   :  { %220 = vsyncpa [#allocation4], 1 }

</bundles_post_ra>
